<compile_context>
chip_gen: v5e
topology: v5e:2x2
jax: 0.10.0
libtpu: 0.0.40
codegen_flags: <defaults>
</compile_context>

<pallas_src>
import functools

import jax
import jax.numpy as jnp
from jax.experimental import pallas as pl
from jax.experimental.pallas import tpu as pltpu


# ----------------------------------------------------------------------------
# Fused ResBlock kernel (one grid step == B images stacked along the row axis)
# ----------------------------------------------------------------------------
def _resblock_kernel(x_ref,
                     w_in_ref, b_in_ref,
                     w0_ref, b0_ref,
                     w1_ref, b1_ref,
                     w2_ref, b2_ref,
                     o_ref,
                     xpad_ref, hpad_a_ref, hpad_b_ref,
                     *, B, H, slope, mxu_dtype):
    MP = B * (H + 2)                 # padded rows in the stacked scratch
    Kin = xpad_ref.shape[1]          # W * Cin
    Nout = hpad_a_ref.shape[1]       # W * Cb

    # Hoisted zero rows (JAX does not CSE broadcasts inside loops).
    zrow_in = jnp.zeros((1, Kin), jnp.float32)
    zrow_h = jnp.zeros((1, Nout), jnp.float32)

    # ---- Stage input rows; keep exactly the 2 halo rows per image at zero. ----
    # Stores start at lane 0 (no column padding) -> dense, unmasked stores.
    for b in range(B):
        r0 = b * (H + 2)
        xpad_ref[r0:r0 + 1, :] = zrow_in
        xpad_ref[r0 + H + 1:r0 + H + 2, :] = zrow_in
        xpad_ref[r0 + 1:r0 + 1 + H, :] = x_ref[b]

    def conv3(src_ref, w_ref, b_ref):
        # Banded-K conv: 3 row-shifted matmuls (the dy taps); the dx taps and
        # the left/right boundary truncation live inside the (K, W*Cout)
        # banded weight.  MXU operands are cast to mxu_dtype, accumulation f32.
        acc = jnp.dot(src_ref[0:MP - 2, :].astype(mxu_dtype), w_ref[0],
                      preferred_element_type=jnp.float32)
        acc = acc + jnp.dot(src_ref[1:MP - 1, :].astype(mxu_dtype), w_ref[1],
                            preferred_element_type=jnp.float32)
        acc = acc + jnp.dot(src_ref[2:MP, :].astype(mxu_dtype), w_ref[2],
                            preferred_element_type=jnp.float32)
        return acc + b_ref[...]       # (1, W*Cout) f32 bias broadcasts over rows

    def lrelu(v):
        return jnp.where(v >= 0, v, v * slope)

    def stage(h, dst_ref):
        # h has MP-2 rows; rows that land on inter-image halo positions contain
        # junk (they mix two adjacent images).  One dense store, then re-zero
        # the 2 halo rows per image (a few tiny row stores).
        dst_ref[1:MP - 1, :] = h
        for b in range(B):
            r0 = b * (H + 2)
            dst_ref[r0:r0 + 1, :] = zrow_h
            dst_ref[r0 + H + 1:r0 + H + 2, :] = zrow_h

    # conv_in branch: conv + LeakyReLU (stays live in f32 vregs)
    x_in = lrelu(conv3(xpad_ref, w_in_ref, b_in_ref))

    # conv_block branch: conv+LReLU, conv+LReLU, conv
    h = lrelu(conv3(xpad_ref, w0_ref, b0_ref))
    stage(h, hpad_a_ref)
    h = lrelu(conv3(hpad_a_ref, w1_ref, b1_ref))
    stage(h, hpad_b_ref)
    out = conv3(hpad_b_ref, w2_ref, b2_ref) + x_in

    # Lane-dense (H, W*Cb) output stores (valid interior rows only).
    for b in range(B):
        r0 = b * (H + 2)
        o_ref[b] = out[r0:r0 + H, :].astype(o_ref.dtype)


# ----------------------------------------------------------------------------
# One-time parameter repack (hoisted out of the per-forward path)
# ----------------------------------------------------------------------------
def _banded_weight(w_hwio, W, dtype):
    """(3, 3, Cin, Cout) HWIO -> per-dy banded (3, W*Cin, W*Cout) matrices.

    band[ky, wi*Cin+ci, wo*Cout+co] = w[ky, wi-wo+1, ci, co] if |wi-wo| <= 1
    else 0.  Out-of-range dx taps at the image borders are simply truncated
    (zero rows), which reproduces SAME zero padding along the width.
    """
    _, _, cin, cout = w_hwio.shape
    wi = jnp.arange(W)[:, None]
    wo = jnp.arange(W)[None, :]
    diff = wi - wo
    mask = (jnp.abs(diff) <= 1).astype(w_hwio.dtype)
    kx = jnp.clip(diff + 1, 0, 2)
    sel = w_hwio[:, kx, :, :] * mask[None, :, :, None, None]   # (3, Wi, Wo, ci, co)
    band = jnp.transpose(sel, (0, 1, 3, 2, 4)).reshape(3, W * cin, W * cout)
    return band.astype(dtype)


def _tile_bias(b, W):
    return jnp.tile(b, W).reshape(1, W * b.shape[0]).astype(jnp.float32)


def prepare_resblock_params(params, W, mxu_dtype=jnp.bfloat16):
    """Repack conv weights/biases once; reuse the result across forward calls."""
    return {
        "w_in": _banded_weight(params["w_in"], W, mxu_dtype),
        "w0": _banded_weight(params["w0"], W, mxu_dtype),
        "w1": _banded_weight(params["w1"], W, mxu_dtype),
        "w2": _banded_weight(params["w2"], W, mxu_dtype),
        "b_in": _tile_bias(params["b_in"], W),
        "b0": _tile_bias(params["b0"], W),
        "b1": _tile_bias(params["b1"], W),
        "b2": _tile_bias(params["b2"], W),
    }


# ----------------------------------------------------------------------------
# Forward wrapper
# ----------------------------------------------------------------------------
def resblock_forward(x_nchw, prep, *, rows_per_step=128):
    N, Cin, H, W = x_nchw.shape
    Cb = prep["b_in"].shape[1] // W
    mxu_dtype = prep["w_in"].dtype

    # Images per grid step: enough matmul rows to amortize MXU fill/drain and
    # per-step overhead, but keep >=2 grid steps when the batch allows so the
    # "parallel" batch axis can be sharded across both v7x TensorCores.
    bt = max(1, rows_per_step // (H + 2))
    if N > 1:
        bt = min(bt, -(-N // 2))      # ceil(N/2) -> at least 2 steps
    bt = min(bt, N)
    n_steps = -(-N // bt)
    Np = n_steps * bt

    # NCHW -> NHWC -> lane-dense (N, H, W*Cin).
    x = jnp.transpose(x_nchw, (0, 2, 3, 1)).reshape(N, H, W * Cin)
    if Np != N:
        x = jnp.concatenate(
            [x, jnp.zeros((Np - N, H, W * Cin), x.dtype)], axis=0)

    MP = bt * (H + 2)
    kernel = functools.partial(_resblock_kernel, B=bt, H=H, slope=0.25,
                               mxu_dtype=mxu_dtype)

    def w_spec(k):
        # Constant index_map -> weights are DMA'd once and stay VMEM-resident.
        return pl.BlockSpec((3, k, W * Cb), lambda n: (0, 0, 0))

    def b_spec():
        return pl.BlockSpec((1, W * Cb), lambda n: (0, 0))

    out = pl.pallas_call(
        kernel,
        out_shape=jax.ShapeDtypeStruct((Np, H, W * Cb), jnp.float32),
        grid=(n_steps,),
        in_specs=[
            pl.BlockSpec((bt, H, W * Cin), lambda n: (n, 0, 0)),
            w_spec(W * Cin), b_spec(),
            w_spec(W * Cin), b_spec(),
            w_spec(W * Cb), b_spec(),
            w_spec(W * Cb), b_spec(),
        ],
        out_specs=pl.BlockSpec((bt, H, W * Cb), lambda n: (n, 0, 0)),
        scratch_shapes=[
            pltpu.VMEM((MP, W * Cin), jnp.float32),   # row-padded input stack
            pltpu.VMEM((MP, W * Cb), jnp.float32),    # row-padded h0 stack
            pltpu.VMEM((MP, W * Cb), jnp.float32),    # row-padded h1 stack
        ],
        compiler_params=pltpu.CompilerParams(
            dimension_semantics=("parallel",)),
    )(x, prep["w_in"], prep["b_in"], prep["w0"], prep["b0"],
      prep["w1"], prep["b1"], prep["w2"], prep["b2"])

    out = out[:N]
    # (N, H, W*Cb) -> NHWC -> NCHW
    return jnp.transpose(out.reshape(N, H, W, Cb), (0, 3, 1, 2))


# ----------------------------------------------------------------------------
# Param init (HWIO weights, matching nn.Conv2d(..., 3, 1, 1, bias=True))
# ----------------------------------------------------------------------------
def init_resblock_params(key, in_channel, base_channel):
    ks = jax.random.split(key, 8)
    scale = 0.1

    def w(k, cin, cout):  # HWIO
        return scale * jax.random.normal(k, (3, 3, cin, cout), jnp.float32)

    def b(k, cout):
        return scale * jax.random.normal(k, (cout,), jnp.float32)

    return {
        "w_in": w(ks[0], in_channel, base_channel),
        "b_in": b(ks[1], base_channel),
        "w0": w(ks[2], in_channel, base_channel),
        "b0": b(ks[3], base_channel),
        "w1": w(ks[4], base_channel, base_channel),
        "b1": b(ks[5], base_channel),
        "w2": w(ks[6], base_channel, base_channel),
        "b2": b(ks[7], base_channel),
    }


# ----------------------------------------------------------------------------
# Pure-JAX reference (silent correctness check)
# ----------------------------------------------------------------------------
def _conv_ref(x, w, b):
    y = jax.lax.conv_general_dilated(
        x, w, (1, 1), "SAME", dimension_numbers=("NHWC", "HWIO", "NHWC"))
    return y + b


def _lrelu_ref(x, slope=0.25):
    return jnp.where(x >= 0, x, slope * x)


def resblock_reference(x_nchw, p):
    x = jnp.transpose(x_nchw, (0, 2, 3, 1))
    x_in = _lrelu_ref(_conv_ref(x, p["w_in"], p["b_in"]))
    h = _lrelu_ref(_conv_ref(x, p["w0"], p["b0"]))
    h = _lrelu_ref(_conv_ref(h, p["w1"], p["b1"]))
    h = _conv_ref(h, p["w2"], p["b2"])
    return jnp.transpose(h + x_in, (0, 3, 1, 2))


if __name__ == "__main__":
    key = jax.random.PRNGKey(0)
    k_x, k_p = jax.random.split(key)

    N, Cin, Cbase, H, W = 2, 4, 8, 16, 16
    x = jax.random.normal(k_x, (N, Cin, H, W), jnp.float32)
    params = init_resblock_params(k_p, Cin, Cbase)

    ref = jax.block_until_ready(resblock_reference(x, params))
    fwd = jax.jit(resblock_forward)

    # f32 MXU path: strict check of the banded-weight conv structure.
    prep_f32 = prepare_resblock_params(params, W, mxu_dtype=jnp.float32)
    out_f32 = jax.block_until_ready(fwd(x, prep_f32))
    assert out_f32.shape == (N, Cbase, H, W)
    if not jnp.allclose(out_f32, ref, atol=5e-4, rtol=5e-4):
        raise AssertionError("Pallas ResBlock (f32 MXU) does not match reference")

    # bf16-operand MXU path (fast path on v6e/v7x): looser tolerance.
    prep_bf16 = prepare_resblock_params(params, W, mxu_dtype=jnp.bfloat16)
    out_bf16 = jax.block_until_ready(fwd(x, prep_bf16))
    assert out_bf16.shape == (N, Cbase, H, W)
    if not jnp.allclose(out_bf16, ref, atol=1e-1, rtol=1e-1):
        raise AssertionError("Pallas ResBlock (bf16 MXU) deviates too much")

    print("KERNEL_OK")
</pallas_src>

<mosaic_0001>
module attributes {stable_mosaic.version = 11 : i64} {
  func.func @_resblock_kernel(%arg0: i32, %arg1: memref<1x16x64xf32, #tpu.memory_space<vmem>>, %arg2: memref<3x64x128xf32, #tpu.memory_space<vmem>>, %arg3: memref<1x128xf32, #tpu.memory_space<vmem>>, %arg4: memref<3x64x128xf32, #tpu.memory_space<vmem>>, %arg5: memref<1x128xf32, #tpu.memory_space<vmem>>, %arg6: memref<3x128x128xf32, #tpu.memory_space<vmem>>, %arg7: memref<1x128xf32, #tpu.memory_space<vmem>>, %arg8: memref<3x128x128xf32, #tpu.memory_space<vmem>>, %arg9: memref<1x128xf32, #tpu.memory_space<vmem>>, %arg10: memref<1x16x128xf32, #tpu.memory_space<vmem>>, %arg11: memref<18x64xf32, #tpu.memory_space<vmem>>, %arg12: memref<18x128xf32, #tpu.memory_space<vmem>>, %arg13: memref<18x128xf32, #tpu.memory_space<vmem>>) attributes {dimension_semantics = [#tpu.dimension_semantics<parallel>], iteration_bounds = array<i64: 2>, scalar_prefetch = 0 : i64, scratch_operands = 3 : i64, tpu.core_type = #tpu.core_type<tc>, window_params = [{transform_indices = @transform_0, window_bounds = array<i64: 1, 16, 64>}, {pipeline_mode = #tpu.pipeline_mode<synchronous>, transform_indices = @transform_1, window_bounds = array<i64: 3, 64, 128>}, {pipeline_mode = #tpu.pipeline_mode<synchronous>, transform_indices = @transform_2, window_bounds = array<i64: 1, 128>}, {pipeline_mode = #tpu.pipeline_mode<synchronous>, transform_indices = @transform_3, window_bounds = array<i64: 3, 64, 128>}, {pipeline_mode = #tpu.pipeline_mode<synchronous>, transform_indices = @transform_4, window_bounds = array<i64: 1, 128>}, {pipeline_mode = #tpu.pipeline_mode<synchronous>, transform_indices = @transform_5, window_bounds = array<i64: 3, 128, 128>}, {pipeline_mode = #tpu.pipeline_mode<synchronous>, transform_indices = @transform_6, window_bounds = array<i64: 1, 128>}, {pipeline_mode = #tpu.pipeline_mode<synchronous>, transform_indices = @transform_7, window_bounds = array<i64: 3, 128, 128>}, {pipeline_mode = #tpu.pipeline_mode<synchronous>, transform_indices = @transform_8, window_bounds = array<i64: 1, 128>}, {transform_indices = @transform_9, window_bounds = array<i64: 1, 16, 128>}]} {
    %cst = arith.constant 0.000000e+00 : f32
    %0 = vector.broadcast %cst : f32 to vector<1x64xf32>
    %cst_0 = arith.constant 0.000000e+00 : f32
    %1 = vector.broadcast %cst_0 : f32 to vector<1x128xf32>
    %c0 = arith.constant 0 : index
    %c0_1 = arith.constant 0 : index
    %2 = vector.load %arg11[%c0, %c0_1] : memref<18x64xf32, #tpu.memory_space<vmem>>, vector<1x64xf32>
    tpu.vector_store %arg11[%c0, %c0_1], %0 {strides = array<i32>} : memref<18x64xf32, #tpu.memory_space<vmem>>, vector<1x64xf32>,
    %c17 = arith.constant 17 : index
    %c0_2 = arith.constant 0 : index
    %3 = vector.load %arg11[%c17, %c0_2] : memref<18x64xf32, #tpu.memory_space<vmem>>, vector<1x64xf32>
    tpu.vector_store %arg11[%c17, %c0_2], %0 {strides = array<i32>} : memref<18x64xf32, #tpu.memory_space<vmem>>, vector<1x64xf32>,
    %c0_3 = arith.constant 0 : index
    %c0_4 = arith.constant 0 : index
    %c0_5 = arith.constant 0 : index
    %4 = vector.load %arg1[%c0_3, %c0_4, %c0_5] : memref<1x16x64xf32, #tpu.memory_space<vmem>>, vector<1x16x64xf32>
    %5 = vector.shape_cast %4 : vector<1x16x64xf32> to vector<16x64xf32>
    %c1 = arith.constant 1 : index
    %c0_6 = arith.constant 0 : index
    %6 = vector.load %arg11[%c1, %c0_6] : memref<18x64xf32, #tpu.memory_space<vmem>>, vector<16x64xf32>
    tpu.vector_store %arg11[%c1, %c0_6], %5 {strides = array<i32>} : memref<18x64xf32, #tpu.memory_space<vmem>>, vector<16x64xf32>,
    %c0_7 = arith.constant 0 : index
    %c0_8 = arith.constant 0 : index
    %7 = vector.load %arg11[%c0_7, %c0_8] : memref<18x64xf32, #tpu.memory_space<vmem>>, vector<16x64xf32>
    %c0_9 = arith.constant 0 : index
    %c0_10 = arith.constant 0 : index
    %c0_11 = arith.constant 0 : index
    %8 = vector.load %arg2[%c0_9, %c0_10, %c0_11] : memref<3x64x128xf32, #tpu.memory_space<vmem>>, vector<1x64x128xf32>
    %9 = vector.shape_cast %8 : vector<1x64x128xf32> to vector<64x128xf32>
    %cst_12 = arith.constant dense<0.000000e+00> : vector<16x128xf32>
    %10 = tpu.matmul %7, %9, %cst_12 {dimension_numbers = #tpu.dot_dimension_numbers<[1], [0], [0], [1], [0, 0, 1, 1], [], []>} : vector<16x64xf32>, vector<64x128xf32>, vector<16x128xf32> -> vector<16x128xf32>
    %c1_13 = arith.constant 1 : index
    %c0_14 = arith.constant 0 : index
    %11 = vector.load %arg11[%c1_13, %c0_14] : memref<18x64xf32, #tpu.memory_space<vmem>>, vector<16x64xf32>
    %c1_15 = arith.constant 1 : index
    %c0_16 = arith.constant 0 : index
    %c0_17 = arith.constant 0 : index
    %12 = vector.load %arg2[%c1_15, %c0_16, %c0_17] : memref<3x64x128xf32, #tpu.memory_space<vmem>>, vector<1x64x128xf32>
    %13 = vector.shape_cast %12 : vector<1x64x128xf32> to vector<64x128xf32>
    %cst_18 = arith.constant dense<0.000000e+00> : vector<16x128xf32>
    %14 = tpu.matmul %11, %13, %cst_18 {dimension_numbers = #tpu.dot_dimension_numbers<[1], [0], [0], [1], [0, 0, 1, 1], [], []>} : vector<16x64xf32>, vector<64x128xf32>, vector<16x128xf32> -> vector<16x128xf32>
    %15 = arith.addf %10, %14 : vector<16x128xf32>
    %c2 = arith.constant 2 : index
    %c0_19 = arith.constant 0 : index
    %16 = vector.load %arg11[%c2, %c0_19] : memref<18x64xf32, #tpu.memory_space<vmem>>, vector<16x64xf32>
    %c2_20 = arith.constant 2 : index
    %c0_21 = arith.constant 0 : index
    %c0_22 = arith.constant 0 : index
    %17 = vector.load %arg2[%c2_20, %c0_21, %c0_22] : memref<3x64x128xf32, #tpu.memory_space<vmem>>, vector<1x64x128xf32>
    %18 = vector.shape_cast %17 : vector<1x64x128xf32> to vector<64x128xf32>
    %cst_23 = arith.constant dense<0.000000e+00> : vector<16x128xf32>
    %19 = tpu.matmul %16, %18, %cst_23 {dimension_numbers = #tpu.dot_dimension_numbers<[1], [0], [0], [1], [0, 0, 1, 1], [], []>} : vector<16x64xf32>, vector<64x128xf32>, vector<16x128xf32> -> vector<16x128xf32>
    %20 = arith.addf %15, %19 : vector<16x128xf32>
    %c0_24 = arith.constant 0 : index
    %c0_25 = arith.constant 0 : index
    %21 = vector.load %arg3[%c0_24, %c0_25] : memref<1x128xf32, #tpu.memory_space<vmem>>, vector<1x128xf32>
    %22 = vector.broadcast %21 : vector<1x128xf32> to vector<16x128xf32>
    %23 = arith.addf %20, %22 : vector<16x128xf32>
    %cst_26 = arith.constant 0.000000e+00 : f32
    %24 = vector.broadcast %cst_26 : f32 to vector<16x128xf32>
    %25 = arith.cmpf oge, %23, %24 : vector<16x128xf32>
    %cst_27 = arith.constant 2.500000e-01 : f32
    %26 = vector.broadcast %cst_27 : f32 to vector<16x128xf32>
    %27 = arith.mulf %23, %26 : vector<16x128xf32>
    %28 = arith.select %25, %23, %27 : vector<16x128xi1>, vector<16x128xf32>
    %c0_28 = arith.constant 0 : index
    %c0_29 = arith.constant 0 : index
    %29 = vector.load %arg11[%c0_28, %c0_29] : memref<18x64xf32, #tpu.memory_space<vmem>>, vector<16x64xf32>
    %c0_30 = arith.constant 0 : index
    %c0_31 = arith.constant 0 : index
    %c0_32 = arith.constant 0 : index
    %30 = vector.load %arg4[%c0_30, %c0_31, %c0_32] : memref<3x64x128xf32, #tpu.memory_space<vmem>>, vector<1x64x128xf32>
    %31 = vector.shape_cast %30 : vector<1x64x128xf32> to vector<64x128xf32>
    %cst_33 = arith.constant dense<0.000000e+00> : vector<16x128xf32>
    %32 = tpu.matmul %29, %31, %cst_33 {dimension_numbers = #tpu.dot_dimension_numbers<[1], [0], [0], [1], [0, 0, 1, 1], [], []>} : vector<16x64xf32>, vector<64x128xf32>, vector<16x128xf32> -> vector<16x128xf32>
    %c1_34 = arith.constant 1 : index
    %c0_35 = arith.constant 0 : index
    %33 = vector.load %arg11[%c1_34, %c0_35] : memref<18x64xf32, #tpu.memory_space<vmem>>, vector<16x64xf32>
    %c1_36 = arith.constant 1 : index
    %c0_37 = arith.constant 0 : index
    %c0_38 = arith.constant 0 : index
    %34 = vector.load %arg4[%c1_36, %c0_37, %c0_38] : memref<3x64x128xf32, #tpu.memory_space<vmem>>, vector<1x64x128xf32>
    %35 = vector.shape_cast %34 : vector<1x64x128xf32> to vector<64x128xf32>
    %cst_39 = arith.constant dense<0.000000e+00> : vector<16x128xf32>
    %36 = tpu.matmul %33, %35, %cst_39 {dimension_numbers = #tpu.dot_dimension_numbers<[1], [0], [0], [1], [0, 0, 1, 1], [], []>} : vector<16x64xf32>, vector<64x128xf32>, vector<16x128xf32> -> vector<16x128xf32>
    %37 = arith.addf %32, %36 : vector<16x128xf32>
    %c2_40 = arith.constant 2 : index
    %c0_41 = arith.constant 0 : index
    %38 = vector.load %arg11[%c2_40, %c0_41] : memref<18x64xf32, #tpu.memory_space<vmem>>, vector<16x64xf32>
    %c2_42 = arith.constant 2 : index
    %c0_43 = arith.constant 0 : index
    %c0_44 = arith.constant 0 : index
    %39 = vector.load %arg4[%c2_42, %c0_43, %c0_44] : memref<3x64x128xf32, #tpu.memory_space<vmem>>, vector<1x64x128xf32>
    %40 = vector.shape_cast %39 : vector<1x64x128xf32> to vector<64x128xf32>
    %cst_45 = arith.constant dense<0.000000e+00> : vector<16x128xf32>
    %41 = tpu.matmul %38, %40, %cst_45 {dimension_numbers = #tpu.dot_dimension_numbers<[1], [0], [0], [1], [0, 0, 1, 1], [], []>} : vector<16x64xf32>, vector<64x128xf32>, vector<16x128xf32> -> vector<16x128xf32>
    %42 = arith.addf %37, %41 : vector<16x128xf32>
    %c0_46 = arith.constant 0 : index
    %c0_47 = arith.constant 0 : index
    %43 = vector.load %arg5[%c0_46, %c0_47] : memref<1x128xf32, #tpu.memory_space<vmem>>, vector<1x128xf32>
    %44 = vector.broadcast %43 : vector<1x128xf32> to vector<16x128xf32>
    %45 = arith.addf %42, %44 : vector<16x128xf32>
    %cst_48 = arith.constant 0.000000e+00 : f32
    %46 = vector.broadcast %cst_48 : f32 to vector<16x128xf32>
    %47 = arith.cmpf oge, %45, %46 : vector<16x128xf32>
    %cst_49 = arith.constant 2.500000e-01 : f32
    %48 = vector.broadcast %cst_49 : f32 to vector<16x128xf32>
    %49 = arith.mulf %45, %48 : vector<16x128xf32>
    %50 = arith.select %47, %45, %49 : vector<16x128xi1>, vector<16x128xf32>
    %c1_50 = arith.constant 1 : index
    %c0_51 = arith.constant 0 : index
    %51 = vector.load %arg12[%c1_50, %c0_51] : memref<18x128xf32, #tpu.memory_space<vmem>>, vector<16x128xf32>
    tpu.vector_store %arg12[%c1_50, %c0_51], %50 {strides = array<i32>} : memref<18x128xf32, #tpu.memory_space<vmem>>, vector<16x128xf32>,
    %c0_52 = arith.constant 0 : index
    %c0_53 = arith.constant 0 : index
    %52 = vector.load %arg12[%c0_52, %c0_53] : memref<18x128xf32, #tpu.memory_space<vmem>>, vector<1x128xf32>
    tpu.vector_store %arg12[%c0_52, %c0_53], %1 {strides = array<i32>} : memref<18x128xf32, #tpu.memory_space<vmem>>, vector<1x128xf32>,
    %c17_54 = arith.constant 17 : index
    %c0_55 = arith.constant 0 : index
    %53 = vector.load %arg12[%c17_54, %c0_55] : memref<18x128xf32, #tpu.memory_space<vmem>>, vector<1x128xf32>
    tpu.vector_store %arg12[%c17_54, %c0_55], %1 {strides = array<i32>} : memref<18x128xf32, #tpu.memory_space<vmem>>, vector<1x128xf32>,
    %c0_56 = arith.constant 0 : index
    %c0_57 = arith.constant 0 : index
    %54 = vector.load %arg12[%c0_56, %c0_57] : memref<18x128xf32, #tpu.memory_space<vmem>>, vector<16x128xf32>
    %c0_58 = arith.constant 0 : index
    %c0_59 = arith.constant 0 : index
    %c0_60 = arith.constant 0 : index
    %55 = vector.load %arg6[%c0_58, %c0_59, %c0_60] : memref<3x128x128xf32, #tpu.memory_space<vmem>>, vector<1x128x128xf32>
    %56 = vector.shape_cast %55 : vector<1x128x128xf32> to vector<128x128xf32>
    %cst_61 = arith.constant dense<0.000000e+00> : vector<16x128xf32>
    %57 = tpu.matmul %54, %56, %cst_61 {dimension_numbers = #tpu.dot_dimension_numbers<[1], [0], [0], [1], [0, 0, 1, 1], [], []>} : vector<16x128xf32>, vector<128x128xf32>, vector<16x128xf32> -> vector<16x128xf32>
    %c1_62 = arith.constant 1 : index
    %c0_63 = arith.constant 0 : index
    %58 = vector.load %arg12[%c1_62, %c0_63] : memref<18x128xf32, #tpu.memory_space<vmem>>, vector<16x128xf32>
    %c1_64 = arith.constant 1 : index
    %c0_65 = arith.constant 0 : index
    %c0_66 = arith.constant 0 : index
    %59 = vector.load %arg6[%c1_64, %c0_65, %c0_66] : memref<3x128x128xf32, #tpu.memory_space<vmem>>, vector<1x128x128xf32>
    %60 = vector.shape_cast %59 : vector<1x128x128xf32> to vector<128x128xf32>
    %cst_67 = arith.constant dense<0.000000e+00> : vector<16x128xf32>
    %61 = tpu.matmul %58, %60, %cst_67 {dimension_numbers = #tpu.dot_dimension_numbers<[1], [0], [0], [1], [0, 0, 1, 1], [], []>} : vector<16x128xf32>, vector<128x128xf32>, vector<16x128xf32> -> vector<16x128xf32>
    %62 = arith.addf %57, %61 : vector<16x128xf32>
    %c2_68 = arith.constant 2 : index
    %c0_69 = arith.constant 0 : index
    %63 = vector.load %arg12[%c2_68, %c0_69] : memref<18x128xf32, #tpu.memory_space<vmem>>, vector<16x128xf32>
    %c2_70 = arith.constant 2 : index
    %c0_71 = arith.constant 0 : index
    %c0_72 = arith.constant 0 : index
    %64 = vector.load %arg6[%c2_70, %c0_71, %c0_72] : memref<3x128x128xf32, #tpu.memory_space<vmem>>, vector<1x128x128xf32>
    %65 = vector.shape_cast %64 : vector<1x128x128xf32> to vector<128x128xf32>
    %cst_73 = arith.constant dense<0.000000e+00> : vector<16x128xf32>
    %66 = tpu.matmul %63, %65, %cst_73 {dimension_numbers = #tpu.dot_dimension_numbers<[1], [0], [0], [1], [0, 0, 1, 1], [], []>} : vector<16x128xf32>, vector<128x128xf32>, vector<16x128xf32> -> vector<16x128xf32>
    %67 = arith.addf %62, %66 : vector<16x128xf32>
    %c0_74 = arith.constant 0 : index
    %c0_75 = arith.constant 0 : index
    %68 = vector.load %arg7[%c0_74, %c0_75] : memref<1x128xf32, #tpu.memory_space<vmem>>, vector<1x128xf32>
    %69 = vector.broadcast %68 : vector<1x128xf32> to vector<16x128xf32>
    %70 = arith.addf %67, %69 : vector<16x128xf32>
    %cst_76 = arith.constant 0.000000e+00 : f32
    %71 = vector.broadcast %cst_76 : f32 to vector<16x128xf32>
    %72 = arith.cmpf oge, %70, %71 : vector<16x128xf32>
    %cst_77 = arith.constant 2.500000e-01 : f32
    %73 = vector.broadcast %cst_77 : f32 to vector<16x128xf32>
    %74 = arith.mulf %70, %73 : vector<16x128xf32>
    %75 = arith.select %72, %70, %74 : vector<16x128xi1>, vector<16x128xf32>
    %c1_78 = arith.constant 1 : index
    %c0_79 = arith.constant 0 : index
    %76 = vector.load %arg13[%c1_78, %c0_79] : memref<18x128xf32, #tpu.memory_space<vmem>>, vector<16x128xf32>
    tpu.vector_store %arg13[%c1_78, %c0_79], %75 {strides = array<i32>} : memref<18x128xf32, #tpu.memory_space<vmem>>, vector<16x128xf32>,
    %c0_80 = arith.constant 0 : index
    %c0_81 = arith.constant 0 : index
    %77 = vector.load %arg13[%c0_80, %c0_81] : memref<18x128xf32, #tpu.memory_space<vmem>>, vector<1x128xf32>
    tpu.vector_store %arg13[%c0_80, %c0_81], %1 {strides = array<i32>} : memref<18x128xf32, #tpu.memory_space<vmem>>, vector<1x128xf32>,
    %c17_82 = arith.constant 17 : index
    %c0_83 = arith.constant 0 : index
    %78 = vector.load %arg13[%c17_82, %c0_83] : memref<18x128xf32, #tpu.memory_space<vmem>>, vector<1x128xf32>
    tpu.vector_store %arg13[%c17_82, %c0_83], %1 {strides = array<i32>} : memref<18x128xf32, #tpu.memory_space<vmem>>, vector<1x128xf32>,
    %c0_84 = arith.constant 0 : index
    %c0_85 = arith.constant 0 : index
    %79 = vector.load %arg13[%c0_84, %c0_85] : memref<18x128xf32, #tpu.memory_space<vmem>>, vector<16x128xf32>
    %c0_86 = arith.constant 0 : index
    %c0_87 = arith.constant 0 : index
    %c0_88 = arith.constant 0 : index
    %80 = vector.load %arg8[%c0_86, %c0_87, %c0_88] : memref<3x128x128xf32, #tpu.memory_space<vmem>>, vector<1x128x128xf32>
    %81 = vector.shape_cast %80 : vector<1x128x128xf32> to vector<128x128xf32>
    %cst_89 = arith.constant dense<0.000000e+00> : vector<16x128xf32>
    %82 = tpu.matmul %79, %81, %cst_89 {dimension_numbers = #tpu.dot_dimension_numbers<[1], [0], [0], [1], [0, 0, 1, 1], [], []>} : vector<16x128xf32>, vector<128x128xf32>, vector<16x128xf32> -> vector<16x128xf32>
    %c1_90 = arith.constant 1 : index
    %c0_91 = arith.constant 0 : index
    %83 = vector.load %arg13[%c1_90, %c0_91] : memref<18x128xf32, #tpu.memory_space<vmem>>, vector<16x128xf32>
    %c1_92 = arith.constant 1 : index
    %c0_93 = arith.constant 0 : index
    %c0_94 = arith.constant 0 : index
    %84 = vector.load %arg8[%c1_92, %c0_93, %c0_94] : memref<3x128x128xf32, #tpu.memory_space<vmem>>, vector<1x128x128xf32>
    %85 = vector.shape_cast %84 : vector<1x128x128xf32> to vector<128x128xf32>
    %cst_95 = arith.constant dense<0.000000e+00> : vector<16x128xf32>
    %86 = tpu.matmul %83, %85, %cst_95 {dimension_numbers = #tpu.dot_dimension_numbers<[1], [0], [0], [1], [0, 0, 1, 1], [], []>} : vector<16x128xf32>, vector<128x128xf32>, vector<16x128xf32> -> vector<16x128xf32>
    %87 = arith.addf %82, %86 : vector<16x128xf32>
    %c2_96 = arith.constant 2 : index
    %c0_97 = arith.constant 0 : index
    %88 = vector.load %arg13[%c2_96, %c0_97] : memref<18x128xf32, #tpu.memory_space<vmem>>, vector<16x128xf32>
    %c2_98 = arith.constant 2 : index
    %c0_99 = arith.constant 0 : index
    %c0_100 = arith.constant 0 : index
    %89 = vector.load %arg8[%c2_98, %c0_99, %c0_100] : memref<3x128x128xf32, #tpu.memory_space<vmem>>, vector<1x128x128xf32>
    %90 = vector.shape_cast %89 : vector<1x128x128xf32> to vector<128x128xf32>
    %cst_101 = arith.constant dense<0.000000e+00> : vector<16x128xf32>
    %91 = tpu.matmul %88, %90, %cst_101 {dimension_numbers = #tpu.dot_dimension_numbers<[1], [0], [0], [1], [0, 0, 1, 1], [], []>} : vector<16x128xf32>, vector<128x128xf32>, vector<16x128xf32> -> vector<16x128xf32>
    %92 = arith.addf %87, %91 : vector<16x128xf32>
    %c0_102 = arith.constant 0 : index
    %c0_103 = arith.constant 0 : index
    %93 = vector.load %arg9[%c0_102, %c0_103] : memref<1x128xf32, #tpu.memory_space<vmem>>, vector<1x128xf32>
    %94 = vector.broadcast %93 : vector<1x128xf32> to vector<16x128xf32>
    %95 = arith.addf %92, %94 : vector<16x128xf32>
    %96 = arith.addf %95, %28 : vector<16x128xf32>
    %c0_104 = arith.constant 0 : index
    %c0_105 = arith.constant 0 : index
    %c0_106 = arith.constant 0 : index
    %97 = vector.load %arg10[%c0_104, %c0_105, %c0_106] : memref<1x16x128xf32, #tpu.memory_space<vmem>>, vector<1x16x128xf32>
    %98 = vector.shape_cast %97 : vector<1x16x128xf32> to vector<16x128xf32>
    %99 = vector.shape_cast %96 : vector<16x128xf32> to vector<1x16x128xf32>
    tpu.vector_store %arg10[%c0_104, %c0_105, %c0_106], %99 {strides = array<i32>} : memref<1x16x128xf32, #tpu.memory_space<vmem>>, vector<1x16x128xf32>,
    return
  }
  func.func @transform_0(%arg0: i32) -> (i32, i32, i32) {
    %c0_i32 = arith.constant 0 : i32
    %c0_i32_0 = arith.constant 0 : i32
    %c0_i32_1 = arith.constant 0 : i32
    return %arg0, %c0_i32, %c0_i32_0 : i32, i32, i32
  }
  func.func @transform_1(%arg0: i32) -> (i32, i32, i32) {
    %c0_i32 = arith.constant 0 : i32
    %c0_i32_0 = arith.constant 0 : i32
    %c0_i32_1 = arith.constant 0 : i32
    %c0_i32_2 = arith.constant 0 : i32
    return %c0_i32, %c0_i32_0, %c0_i32_1 : i32, i32, i32
  }
  func.func @transform_2(%arg0: i32) -> (i32, i32) {
    %c0_i32 = arith.constant 0 : i32
    %c0_i32_0 = arith.constant 0 : i32
    %c0_i32_1 = arith.constant 0 : i32
    return %c0_i32, %c0_i32_0 : i32, i32
  }
  func.func @transform_3(%arg0: i32) -> (i32, i32, i32) {
    %c0_i32 = arith.constant 0 : i32
    %c0_i32_0 = arith.constant 0 : i32
    %c0_i32_1 = arith.constant 0 : i32
    %c0_i32_2 = arith.constant 0 : i32
    return %c0_i32, %c0_i32_0, %c0_i32_1 : i32, i32, i32
  }
  func.func @transform_4(%arg0: i32) -> (i32, i32) {
    %c0_i32 = arith.constant 0 : i32
    %c0_i32_0 = arith.constant 0 : i32
    %c0_i32_1 = arith.constant 0 : i32
    return %c0_i32, %c0_i32_0 : i32, i32
  }
  func.func @transform_5(%arg0: i32) -> (i32, i32, i32) {
    %c0_i32 = arith.constant 0 : i32
    %c0_i32_0 = arith.constant 0 : i32
    %c0_i32_1 = arith.constant 0 : i32
    %c0_i32_2 = arith.constant 0 : i32
    return %c0_i32, %c0_i32_0, %c0_i32_1 : i32, i32, i32
  }
  func.func @transform_6(%arg0: i32) -> (i32, i32) {
    %c0_i32 = arith.constant 0 : i32
    %c0_i32_0 = arith.constant 0 : i32
    %c0_i32_1 = arith.constant 0 : i32
    return %c0_i32, %c0_i32_0 : i32, i32
  }
  func.func @transform_7(%arg0: i32) -> (i32, i32, i32) {
    %c0_i32 = arith.constant 0 : i32
    %c0_i32_0 = arith.constant 0 : i32
    %c0_i32_1 = arith.constant 0 : i32
    %c0_i32_2 = arith.constant 0 : i32
    return %c0_i32, %c0_i32_0, %c0_i32_1 : i32, i32, i32
  }
  func.func @transform_8(%arg0: i32) -> (i32, i32) {
    %c0_i32 = arith.constant 0 : i32
    %c0_i32_0 = arith.constant 0 : i32
    %c0_i32_1 = arith.constant 0 : i32
    return %c0_i32, %c0_i32_0 : i32, i32
  }
  func.func @transform_9(%arg0: i32) -> (i32, i32, i32) {
    %c0_i32 = arith.constant 0 : i32
    %c0_i32_0 = arith.constant 0 : i32
    %c0_i32_1 = arith.constant 0 : i32
    return %arg0, %c0_i32, %c0_i32_0 : i32, i32, i32
  }
}

</mosaic_0001>

<bundles_post_ra>
// kernel: resblock_forward.1
= control target key start
LH: loop header
LB: loop body
LE: loop exit
PB: predicated region body
PF: predicated region fallthrough
CT: control target
= control target key end

     0   :  { %14 = vsyncpa [#allocation6], 0  ;;  %s1506_s0 = inlined_call_operand.vmem [shape: f32[2,16,64], index: 0, kind: input, shape index: {}]   ;;  %s1507_s1 = inlined_call_operand.hbm [shape: f32[3,64,128], index: 1, kind: input, shape index: {}]   ;;  %s1508_s2 = inlined_call_operand.vmem [shape: f32[1,128], index: 2, kind: input, shape index: {}]   ;;  %s1509_s3 = inlined_call_operand.hbm [shape: f32[3,64,128], index: 3, kind: input, shape index: {}]   ;;  %s1510_s4 = inlined_call_operand.vmem [shape: f32[1,128], index: 4, kind: input, shape index: {}]   ;;  %s1511_s5 = inlined_call_operand.vmem [shape: f32[3,128,128], index: 5, kind: input, shape index: {}]   ;;  %s1512_s6 = inlined_call_operand.vmem [shape: f32[1,128], index: 6, kind: input, shape index: {}]   ;;  %s1513_s7 = inlined_call_operand.hbm [shape: f32[3,128,128], index: 7, kind: input, shape index: {}]   ;;  %s1514_s8 = inlined_call_operand.vmem [shape: f32[1,128], index: 8, kind: input, shape index: {}]   ;;  %s1515_s9 = inlined_call_operand.vmem [shape: f32[2,16,128], index: 9, kind: output, shape index: {}]  }
   0x1   :  { %15 = vsyncpa [#allocation8], 0  ;;  %s1274_s30 = smov 0  }
   0x2 LB: > { %s1280_s10 = sadd.s32 4294967295, %s1216_s30   ;;  %p1005_p0 = scmp.ge.s32.totalorder %s1216_s30, 1  ;;  %s1216_s30 = sphi %s1274_s30, %s21_s30  }
   0x3   : > { %p246_p1 = scmp.lt.s32.totalorder %s1216_s30, 3  ;;  %p1088_p2 = scmp.eq.s32.totalorder %s1280_s10, 0 }
   0x4   : > { %s274_s13 = sshll.u32 %s1509_s3, 4  ;;  %s257_s17 = sshll.u32 %s1507_s1, 4  ;;  %s275_s13 = int_to_ptr.hbm [resolvable:$true] %s274_s13  ;;  %s258_s17 = int_to_ptr.hbm [resolvable:$true] %s257_s17 }
   0x5   : > { %p1288_p3 = pnand %p1005_p0, %p246_p1  ;;  %s1218_s18 = smov [#allocation7]  }
   0x6   : > { %s276_s19 = sshll.u32 %s1218_s18, 4  ;;  %s1219_s20 = smov [#allocation5]   ;;  %s277_s19 = int_to_ptr.vmem [resolvable:$true] %s276_s19 }
   0x7   : > { %p1078_p4 = pneg %p1288_p3  ;;  %s259_s21 = sshll.u32 %s1219_s20, 4  ;;  %s260_s21 = int_to_ptr.vmem [resolvable:$true] %s259_s21 }
   0x8   : > { %s297_s24 = sshll.u32 %s1513_s7, 4  ;;  %s1220_s25 = smov 128   ;;  %s298_s24 = int_to_ptr.hbm [resolvable:$true] %s297_s24 }
   0x9   : > { %p1079_p5 = pnand %p1088_p2, %p1078_p4  ;;  %s1221_s26 = smov 8  }
   0xa   : > { %s1222_s27 = smov [#allocation9]   ;;  %326 = sbr.rel (%p1288_p3) target bundleno = 502 (0x1f6), region = 56 }
   0xb   : > { %1084 = dma.hbm_to_vmem [thread:$0]  (!%p1079_p5), %s275_s13, 3072, %s277_s19, [#allocation8], %s1220_s25, %s1220_s25, %s1221_s26  }
   0xc   : > { %1081 = dma.hbm_to_vmem [thread:$0]  (!%p1079_p5), %s258_s17, 3072, %s260_s21, [#allocation6], %s1220_s25, %s1220_s25, %s1221_s26  }
   0xd   : > { %s299_s28 = sshll.u32 %s1222_s27, 4  ;;  %s300_s28 = int_to_ptr.vmem [resolvable:$true] %s299_s28 }
   0xe   : > { %1087 = dma.hbm_to_vmem [thread:$0]  (!%p1079_p5), %s298_s24, 6144, %s300_s28, [#allocation8], %s1220_s25, %s1220_s25, %s1221_s26  }
   0xf   : > { %1207 = dma.done.wait (%p1088_p2), [#allocation6], 3072  }
  0x10   : > { %1209 = vsyncadd (%p1088_p2), [#allocation6], 4294964224 }
  0x11   : > { %1211 = dma.done.wait (%p1088_p2), [#allocation8], 9216  }
  0x12   : > { %1213 = vsyncadd (%p1088_p2), [#allocation8], 4294958080  ;;  %vm383_vm0 = vcmask 516096   ;;  %v1223_v0 = vmov 0.0   ;;  %p373_p6 = scmp.lt.s32.totalorder %s1280_s10, 1  ;;  %v411_v1 = vld [vmem:[#allocation5 + $0x78] sm:$0xff] }
  0x13   : > { %384 = vst.msk [vmem:[#allocation2] sm:$0x1] %vm383_vm0, %v1223_v0  ;;  %v400_v2 = vld [vmem:[#allocation5 + $0x38] sm:$0xff]  ;;  %426 = vmatpush.msra.mxu0 %v411_v1  ;;  %v410_v4 = vld [vmem:[#allocation5 + $0x70] sm:$0xff]  ;;  %v409_v7 = vld [vmem:[#allocation5 + $0x68] sm:$0xff]  ;;  %vm388_vm1 = vcmask 523264  }
  0x14   : > { %385 = vst.msk [vmem:[#allocation2 + $0x11] sm:$0x1] %vm383_vm0, %v1223_v0  ;;  %s1518_s10 = smov (!%p373_p6, %s1280_s10), 1  ;;  %v480_v3 = vld [vmem:[#allocation5 + $0xb8] sm:$0xff]  ;;  %455 = vmatpush.msra.mxu1 %v400_v2  ;;  %v399_v5 = vld [vmem:[#allocation5 + $0x30] sm:$0xff]  ;;  %v398_v8 = vld [vmem:[#allocation5 + $0x28] sm:$0xff] }
  0x15   : > { %635 = vst [vmem:[#allocation3] sm:$0x1] %v1223_v0  ;;  %v479_v6 = vld [vmem:[#allocation5 + $0xb0] sm:$0xff]  ;;  %495 = vmatpush.msra.mxu2 %v480_v3  ;;  %427 = vmatpush.msra.mxu0 %v410_v4  ;;  %v478_v9 = vld [vmem:[#allocation5 + $0xa8] sm:$0xff]  ;;  %s1064_s29 = sshll.u32 %s1518_s10, 4  ;;  %v408_v10 = vld [vmem:[#allocation5 + $0x60] sm:$0xff] }
  0x16   : > { %636 = vst [vmem:[#allocation3 + $0x11] sm:$0x1] %v1223_v0  ;;  %456 = vmatpush.msra.mxu1 %v399_v5  ;;  %v397_v11 = vld [vmem:[#allocation5 + $0x20] sm:$0xff]  ;;  %v407_v13 = vld [vmem:[#allocation5 + $0x58] sm:$0xff]  ;;  %s377_s13 = scalar_lea.vmem %s1506_s0, %s1064_s29  ;;  %v539_v17 = vld [vmem:[#allocation7 + $0x70] sm:$0xff]  ;;  %s382_s12 = scalar_lea.vmem %s1515_s9, %s1064_s29 }
  0x17   : > { %778 = vst [vmem:[#allocation4] sm:$0x1] %v1223_v0  ;;  %496 = vmatpush.msra.mxu2 %v479_v6  ;;  %428 = vmatpush.msra.mxu0 %v409_v7  ;;  %v477_v12 = vld [vmem:[#allocation5 + $0xa0] sm:$0xff]  ;;  %v396_v14 = vld [vmem:[#allocation5 + $0x18] sm:$0xff]  ;;  %v406_v18 = vld [vmem:[#allocation5 + $0x50] sm:$0xff] }
  0x18   : > { %779 = vst [vmem:[#allocation4 + $0x11] sm:$0x1] %v1223_v0  ;;  %457 = vmatpush.msra.mxu1 %v398_v8  ;;  %v540_v15 = vld [vmem:[#allocation7 + $0x78] sm:$0xff]  ;;  %v395_v19 = vld [vmem:[#allocation5 + $0x10] sm:$0xff]  ;;  %v538_v21 = vld [vmem:[#allocation7 + $0x68] sm:$0xff] }
  0x19   : > { %497 = vmatpush.msra.mxu2 %v478_v9  ;;  %429 = vmatpush.msra.mxu0 %v408_v10  ;;  %v476_v16 = vld [vmem:[#allocation5 + $0x98] sm:$0xff]  ;;  %v475_v20 = vld [vmem:[#allocation5 + $0x90] sm:$0xff]  ;;  %v387_v23 = vld [vmem:[%s377_s13 + $0x8] sm:$0xff] }
  0x1a   : > { %458 = vmatpush.msra.mxu1 %v397_v11  ;;  %549 = vmatpush.msra.mxu3 %v540_v15  ;;  %v386_v22 = vld [vmem:[%s377_s13] sm:$0xff]  ;;  %v405_v24 = vld [vmem:[#allocation5 + $0x48] sm:$0xff]  ;;  %390 = vst.msk [vmem:[#allocation2 + $0x9] sm:$0xff] %vm388_vm1, %v387_v23  ;;  %v537_v27 = vld [vmem:[#allocation7 + $0x60] sm:$0xff] }
  0x1b   : > { %498 = vmatpush.msra.mxu2 %v477_v12  ;;  %430 = vmatpush.msra.mxu0 %v407_v13  ;;  %v394_v25 = vld [vmem:[#allocation5 + $0x8] sm:$0xff]  ;;  %389 = vst.msk [vmem:[#allocation2 + $0x1] sm:$0xff] %vm388_vm1, %v386_v22  ;;  %v404_v28 = vld [vmem:[#allocation5 + $0x40] sm:$0xff]  ;;  %v531_v31 = vld [vmem:[#allocation7 + $0x38] sm:$0xff] }
  0x1c   : > { %459 = vmatpush.msra.mxu1 %v396_v14  ;;  %550 = vmatpush.msra.mxu3 %v539_v17  ;;  %v474_v26 = vld [vmem:[#allocation5 + $0x88] sm:$0xff]  ;;  %v393_v29 = vld [vmem:[#allocation5] sm:$0xff]  ;;  %v595_v32 = vld [vmem:[#allocation7 + $0xb8] sm:$0xff] }
  0x1d   : > { %499 = vmatpush.msra.mxu2 %v476_v16  ;;  %431 = vmatpush.msra.mxu0 %v406_v18  ;;  %v473_v30 = vld [vmem:[#allocation5 + $0x80] sm:$0xff]  ;;  %v536_v33 = vld [vmem:[#allocation7 + $0x58] sm:$0xff]  ;;  %v530_v34 = vld [vmem:[#allocation7 + $0x30] sm:$0xff] }
  0x1e   : > { %460 = vmatpush.msra.mxu1 %v395_v19  ;;  %551 = vmatpush.msra.mxu3 %v538_v21  ;;  %v594_v35 = vld [vmem:[#allocation7 + $0xb0] sm:$0xff]  ;;  %v529_v40 = vld [vmem:[#allocation7 + $0x28] sm:$0xff]  ;;  %v528_v43 = vld [vmem:[#allocation7 + $0x20] sm:$0xff] }
  0x1f   : > { %500 = vmatpush.msra.mxu2 %v475_v20  ;;  %432 = vmatpush.msra.mxu0 %v405_v24  ;;  %v535_v36 = vld [vmem:[#allocation7 + $0x50] sm:$0xff]  ;;  %v593_v41 = vld [vmem:[#allocation7 + $0xa8] sm:$0xff]  ;;  %v592_v44 = vld [vmem:[#allocation7 + $0xa0] sm:$0xff] }
  0x20   : > { %461 = vmatpush.msra.mxu1 %v394_v25  ;;  %552 = vmatpush.msra.mxu3 %v537_v27  ;;  %v534_v42 = vld [vmem:[#allocation7 + $0x48] sm:$0xff]  ;;  %v533_v45 = vld [vmem:[#allocation7 + $0x40] sm:$0xff]  ;;  %v527_v46 = vld [vmem:[#allocation7 + $0x18] sm:$0xff] }
  0x21   : > { %501 = vmatpush.msra.mxu2 %v474_v26  ;;  %433 = vmatpush.msra.mxu0 %v404_v28  ;;  %v402_v47 = vld [vmem:[#allocation2 + $0x9] sm:$0xff]  ;;  %v526_v50 = vld [vmem:[#allocation7 + $0x10] sm:$0xff]  ;;  %v591_v51 = vld [vmem:[#allocation7 + $0x98] sm:$0xff] }
  0x22   : > { %462 = vmatpush.msra.mxu1 %v393_v29  ;;  %v401_v37 = vld [vmem:[#allocation2 + $0x1] sm:$0xff]  ;;  %553 = vmatpush.msra.mxu3 %v536_v33  ;;  %v471_v49 = vld [vmem:[#allocation2 + $0xa] sm:$0xff]  ;;  %v590_v53 = vld [vmem:[#allocation7 + $0x90] sm:$0xff] }
  0x23   : > { %502 = vmatpush.msra.mxu2 %v473_v30  ;;  %572 = vmatpush.msrb.mxu0 %v531_v31  ;;  %v391_v38 = vld [vmem:[#allocation2] sm:$0xff]  ;;  %v392_v48 = vld [vmem:[#allocation2 + $0x8] sm:$0xff]  ;;  %v525_v52 = vld [vmem:[#allocation7 + $0x8] sm:$0xff] }
  0x24   : > { %604 = vmatpush.msrb.mxu1 %v595_v32  ;;  %1018 = vmatmul.msk.f32.vlgmr.msra.gmra.mxu0 %vm388_vm1, %v401_v37  ;;  %v470_v39 = vld [vmem:[#allocation2 + $0x2] sm:$0xff]  ;;  %v589_v55 = vld [vmem:[#allocation7 + $0x88] sm:$0xff]  ;;  %v1045_v57 = vld [vmem:[%s1511_s5 + $0xf8] sm:$0xff] }
  0x25   : > { %1020 = vmatmul.msk.f32.vlgmr.msra.gmra.mxu1 %vm388_vm1, %v391_v38  ;;  %1022 = vmatmul.msk.f32.vlgmr.msra.gmra.mxu2 %vm388_vm1, %v470_v39  ;;  %v524_v54 = vld [vmem:[#allocation7] sm:$0xff]  ;;  %v1044_v58 = vld [vmem:[%s1511_s5 + $0xf0] sm:$0xff]  ;;  %v654_v60 = vld [vmem:[%s1511_s5 + $0x78] sm:$0xff] }
  0x26   : > { %573 = vmatpush.msrb.mxu0 %v530_v34  ;;  %605 = vmatpush.msrb.mxu1 %v594_v35  ;;  %v588_v56 = vld [vmem:[#allocation7 + $0x80] sm:$0xff]  ;;  %v653_v61 = vld [vmem:[%s1511_s5 + $0x70] sm:$0xff]  ;;  %v1042_v62 = vld [vmem:[%s1511_s5 + $0xe0] sm:$0xff] }
  0x27   : > { %554 = vmatpush.msra.mxu3 %v535_v36  ;;  %674 = vmatpush.msrb.mxu2 %v1045_v57  ;;  %v1043_v59 = vld [vmem:[%s1511_s5 + $0xe8] sm:$0xff]  ;;  %v1041_v63 = vld [vmem:[%s1511_s5 + $0xd8] sm:$0xff]  ;;  %v1040_v0 = vld [vmem:[%s1511_s5 + $0xd0] sm:$0xff] }
  0x28   : > { %574 = vmatpush.msrb.mxu0 %v529_v40  ;;  %606 = vmatpush.msrb.mxu1 %v593_v41  ;;  %v652_v1 = vld [vmem:[%s1511_s5 + $0x68] sm:$0xff]  ;;  %v651_v3 = vld [vmem:[%s1511_s5 + $0x60] sm:$0xff]  ;;  %v650_v5 = vld [vmem:[%s1511_s5 + $0x58] sm:$0xff] }
  0x29   : > { %555 = vmatpush.msra.mxu3 %v534_v42  ;;  %675 = vmatpush.msrb.mxu2 %v1044_v58  ;;  %v1039_v2 = vld [vmem:[%s1511_s5 + $0xc8] sm:$0xff]  ;;  %v1038_v4 = vld [vmem:[%s1511_s5 + $0xc0] sm:$0xff]  ;;  %v1061_v6 = vld [vmem:[%s1511_s5 + $0x178] sm:$0xff] }
  0x2a   : > { %575 = vmatpush.msrb.mxu0 %v528_v43  ;;  %607 = vmatpush.msrb.mxu1 %v592_v44  ;;  %v1037_v7 = vld [vmem:[%s1511_s5 + $0xb8] sm:$0xff]  ;;  %v649_v8 = vld [vmem:[%s1511_s5 + $0x50] sm:$0xff]  ;;  %v648_v11 = vld [vmem:[%s1511_s5 + $0x48] sm:$0xff] }
  0x2b   : > { %556 = vmatpush.msra.mxu3 %v533_v45  ;;  %676 = vmatpush.msrb.mxu2 %v1043_v59  ;;  %v1060_v9 = vld [vmem:[%s1511_s5 + $0x170] sm:$0xff]  ;;  %v1059_v12 = vld [vmem:[%s1511_s5 + $0x168] sm:$0xff]  ;;  %v647_v14 = vld [vmem:[%s1511_s5 + $0x40] sm:$0xff] }
  0x2c   : > { %576 = vmatpush.msrb.mxu0 %v527_v46  ;;  %1024 = vmatmul.msk.f32.vlgmr.msra.gmra.mxu3 %vm388_vm1, %v401_v37  ;;  %v1036_v10 = vld [vmem:[%s1511_s5 + $0xb0] sm:$0xff]  ;;  %v1035_v13 = vld [vmem:[%s1511_s5 + $0xa8] sm:$0xff]  ;;  %v1058_v15 = vld [vmem:[%s1511_s5 + $0x160] sm:$0xff] }
  0x2d   : > { %1019 = vmatmul.msk.f32.gmra.mxu0 %vm388_vm1, %v402_v47  ;;  %1021 = vmatmul.msk.f32.gmra.mxu1 %vm388_vm1, %v392_v48  ;;  %v1034_v16 = vld [vmem:[%s1511_s5 + $0xa0] sm:$0xff]  ;;  %v646_v17 = vld [vmem:[%s1511_s5 + $0x38] sm:$0xff]  ;;  %v645_v20 = vld [vmem:[%s1511_s5 + $0x30] sm:$0xff] }
  0x2e   : > { %1023 = vmatmul.msk.f32.gmra.mxu2 %vm388_vm1, %v471_v49  ;;  %577 = vmatpush.msrb.mxu0 %v526_v50  ;;  %v1057_v18 = vld [vmem:[%s1511_s5 + $0x158] sm:$0xff]  ;;  %v1056_v21 = vld [vmem:[%s1511_s5 + $0x150] sm:$0xff]  ;;  %v644_v23 = vld [vmem:[%s1511_s5 + $0x28] sm:$0xff] }
  0x2f   : > { %608 = vmatpush.msrb.mxu1 %v591_v51  ;;  %697 = vmatpush.msrb.mxu3 %v654_v60  ;;  %v1033_v19 = vld [vmem:[%s1511_s5 + $0x98] sm:$0xff]  ;;  %v1032_v22 = vld [vmem:[%s1511_s5 + $0x90] sm:$0xff]  ;;  %v1055_v24 = vld [vmem:[%s1511_s5 + $0x148] sm:$0xff] }
  0x30   : > { %578 = vmatpush.msrb.mxu0 %v525_v52  ;;  %677 = vmatpush.msrb.mxu2 %v1042_v62  ;;  %v1031_v25 = vld [vmem:[%s1511_s5 + $0x88] sm:$0xff]  ;;  %v643_v26 = vld [vmem:[%s1511_s5 + $0x20] sm:$0xff]  ;;  %v642_v29 = vld [vmem:[%s1511_s5 + $0x18] sm:$0xff] }
  0x31   : > { %609 = vmatpush.msrb.mxu1 %v590_v53  ;;  %698 = vmatpush.msrb.mxu3 %v653_v61  ;;  %v1054_v27 = vld [vmem:[%s1511_s5 + $0x140] sm:$0xff]  ;;  %v1053_v30 = vld [vmem:[%s1511_s5 + $0x138] sm:$0xff]  ;;  %v641_v31 = vld [vmem:[%s1511_s5 + $0x10] sm:$0xff] }
  0x32   : > { %579 = vmatpush.msrb.mxu0 %v524_v54  ;;  %678 = vmatpush.msrb.mxu2 %v1041_v63  ;;  %v1030_v28 = vld [vmem:[%s1511_s5 + $0x80] sm:$0xff]  ;;  %v1052_v32 = vld [vmem:[%s1511_s5 + $0x130] sm:$0xff]  ;;  %v640_v33 = vld [vmem:[%s1511_s5 + $0x8] sm:$0xff] }
  0x33   : > { %610 = vmatpush.msrb.mxu1 %v589_v55  ;;  %699 = vmatpush.msrb.mxu3 %v652_v1  ;;  %v1051_v34 = vld [vmem:[%s1511_s5 + $0x128] sm:$0xff]  ;;  %v1049_v40 = vld [vmem:[%s1511_s5 + $0x118] sm:$0xff]  ;;  %v1048_v41 = vld [vmem:[%s1511_s5 + $0x110] sm:$0xff] }
  0x34   : > { %1025 = vmatmul.msk.f32.gmra.mxu3 %vm388_vm1, %v402_v47  ;;  %679 = vmatpush.msrb.mxu2 %v1040_v0  ;;  %v1047_v42 = vld [vmem:[%s1511_s5 + $0x108] sm:$0xff]  ;;  %v1046_v44 = vld [vmem:[%s1511_s5 + $0x100] sm:$0xff]  ;;  %v796_v58 = vld [vmem:[#allocation9 + $0x70] sm:$0xff] }
  0x35   : > { %1026 = vmatmul.msk.f32.vlgmr.msrb.gmra.mxu0 %vm388_vm1, %v391_v38  ;;  %611 = vmatpush.msrb.mxu1 %v588_v56  ;;  %v639_v38 = vld [vmem:[%s1511_s5] sm:$0xff]  ;;  %v815_v56 = vld [vmem:[#allocation9 + $0xf0] sm:$0xff]  ;;  %v814_v59 = vld [vmem:[#allocation9 + $0xe8] sm:$0xff] }
  0x36   : > { %1028 = vmatmul.msk.f32.vlgmr.msrb.gmra.mxu1 %vm388_vm1, %v470_v39  ;;  %680 = vmatpush.msrb.mxu2 %v1039_v2  ;;  %v1050_v39 = vld [vmem:[%s1511_s5 + $0x120] sm:$0xff]  ;;  %v795_v60 = vld [vmem:[#allocation9 + $0x68] sm:$0xff]  ;;  %v813_v0 = vld [vmem:[#allocation9 + $0xe0] sm:$0xff] }
  0x37   : > { %700 = vmatpush.msrb.mxu3 %v651_v3  ;;  %739 = vmatpush.msra.mxu0 %v1061_v6  ;;  %v1109_v53 = vld [vmem:[%s1510_s4] ss:$0 sm:$0xff]  ;;  %v794_v1 = vld [vmem:[#allocation9 + $0x60] sm:$0xff]  ;;  %v880_v2 = vld [vmem:[#allocation9 + $0x170] sm:$0xff] }
  0x38   : > { %681 = vmatpush.msrb.mxu2 %v1038_v4  ;;  %v816_v54 = vld [vmem:[#allocation9 + $0xf8] sm:$0xff]  ;;  %v879_v4 = vld [vmem:[#allocation9 + $0x168] sm:$0xff] }
  0x39   : > { %701 = vmatpush.msrb.mxu3 %v650_v5  ;;  %740 = vmatpush.msra.mxu0 %v1060_v9  ;;  %v797_v55 = vld [vmem:[#allocation9 + $0x78] sm:$0xff] }
  0x3a   : > { %682 = vmatpush.msrb.mxu2 %v1037_v7  ;;  %817 = vmatpush.msra.mxu1 %v816_v54  ;;  %v881_v62 = vld [vmem:[#allocation9 + $0x178] sm:$0xff]  ;;  %v867_v54 = vld [vmem:[#allocation9 + $0x108] sm:$0xff] }
  0x3b   : > { %702 = vmatpush.msrb.mxu3 %v649_v8  ;;  %741 = vmatpush.msra.mxu0 %v1059_v12  ;;  %v812_v6 = vld [vmem:[#allocation9 + $0xd8] sm:$0xff]  ;;  %v792_v12 = vld [vmem:[#allocation9 + $0x50] sm:$0xff] }
  0x3c   : > { %683 = vmatpush.msrb.mxu2 %v1036_v10  ;;  %818 = vmatpush.msra.mxu1 %v815_v56  ;;  %v793_v7 = vld [vmem:[#allocation9 + $0x58] sm:$0xff]  ;;  %v866_v56 = vld [vmem:[#allocation9 + $0x100] sm:$0xff] }
  0x3d   : > { %1027 = vmatmul.msk.f32.gmra.mxu0 %vm388_vm1, %v392_v48  ;;  %703 = vmatpush.msrb.mxu3 %v648_v11  ;;  %v811_v11 = vld [vmem:[#allocation9 + $0xd0] sm:$0xff] }
  0x3e   : > { %1029 = vmatmul.msk.f32.gmra.mxu1 %vm388_vm1, %v471_v49  ;;  %684 = vmatpush.msrb.mxu2 %v1035_v13 }
  0x3f   : > { %704 = vmatpush.msrb.mxu3 %v647_v14  ;;  %742 = vmatpush.msra.mxu0 %v1058_v15  ;;  %v810_v14 = vld [vmem:[#allocation9 + $0xc8] sm:$0xff] }
  0x40   : > { %685 = vmatpush.msrb.mxu2 %v1034_v16  ;;  %819 = vmatpush.msra.mxu1 %v814_v59  ;;  %v791_v15 = vld [vmem:[#allocation9 + $0x48] sm:$0xff] }
  0x41   : > { %705 = vmatpush.msrb.mxu3 %v646_v17  ;;  %743 = vmatpush.msra.mxu0 %v1057_v18 }
  0x42   : > { %686 = vmatpush.msrb.mxu2 %v1033_v19  ;;  %820 = vmatpush.msra.mxu1 %v813_v0 }
  0x43   : > { %706 = vmatpush.msrb.mxu3 %v645_v20  ;;  %744 = vmatpush.msra.mxu0 %v1056_v21 }
  0x44   : > { %687 = vmatpush.msrb.mxu2 %v1032_v22  ;;  %821 = vmatpush.msra.mxu1 %v812_v6 }
  0x45   : > { %707 = vmatpush.msrb.mxu3 %v644_v23  ;;  %745 = vmatpush.msra.mxu0 %v1055_v24  ;;  %v809_v23 = vld [vmem:[#allocation9 + $0xc0] sm:$0xff]  ;;  %v808_v24 = vld [vmem:[#allocation9 + $0xb8] sm:$0xff] }
  0x46   : > { %688 = vmatpush.msrb.mxu2 %v1031_v25  ;;  %822 = vmatpush.msra.mxu1 %v811_v11  ;;  %v807_v25 = vld [vmem:[#allocation9 + $0xb0] sm:$0xff] }
  0x47   : > { %708 = vmatpush.msrb.mxu3 %v643_v26  ;;  %746 = vmatpush.msra.mxu0 %v1054_v27  ;;  %v806_v26 = vld [vmem:[#allocation9 + $0xa8] sm:$0xff]  ;;  %v790_v27 = vld [vmem:[#allocation9 + $0x40] sm:$0xff] }
  0x48   : > { %689 = vmatpush.msrb.mxu2 %v1030_v28  ;;  %823 = vmatpush.msra.mxu1 %v810_v14  ;;  %v878_v28 = vld [vmem:[#allocation9 + $0x160] sm:$0xff]  ;;  %v1108_v14 = vld [vmem:[%s1508_s2] ss:$0 sm:$0xff] }
  0x49   : > { %709 = vmatpush.msrb.mxu3 %v642_v29  ;;  %747 = vmatpush.msra.mxu0 %v1053_v30  ;;  %v805_v29 = vld [vmem:[#allocation9 + $0xa0] sm:$0xff]  ;;  %v789_v30 = vld [vmem:[#allocation9 + $0x38] sm:$0xff] }
  0x4a   : > { %840 = vmatpush.msra.mxu2 %v797_v55  ;;  %824 = vmatpush.msra.mxu1 %v809_v23 }
  0x4b   : > { %710 = vmatpush.msrb.mxu3 %v641_v31  ;;  %748 = vmatpush.msra.mxu0 %v1052_v32  ;;  %v877_v31 = vld [vmem:[#allocation9 + $0x158] sm:$0xff] }
  0x4c   : > { %841 = vmatpush.msra.mxu2 %v796_v58  ;;  %825 = vmatpush.msra.mxu1 %v808_v24  ;;  %v804_v32 = vld [vmem:[#allocation9 + $0x98] sm:$0xff] }
  0x4d   : > { %711 = vmatpush.msrb.mxu3 %v640_v33  ;;  %749 = vmatpush.msra.mxu0 %v1051_v34  ;;  %v788_v33 = vld [vmem:[#allocation9 + $0x30] sm:$0xff] }
  0x4e   : > { %842 = vmatpush.msra.mxu2 %v795_v60  ;;  %826 = vmatpush.msra.mxu1 %v807_v25  ;;  %v876_v34 = vld [vmem:[#allocation9 + $0x150] sm:$0xff]  ;;  %v1110_v60 = vld [vmem:[%s1512_s6] ss:$0 sm:$0xff] }
  0x4f   : > { %712 = vmatpush.msrb.mxu3 %v639_v38  ;;  %750 = vmatpush.msra.mxu0 %v1050_v39  ;;  %v802_v38 = vld [vmem:[#allocation9 + $0x88] sm:$0xff]  ;;  %v786_v39 = vld [vmem:[#allocation9 + $0x20] sm:$0xff] }
  0x50   : > { %843 = vmatpush.msra.mxu2 %v794_v1  ;;  %827 = vmatpush.msra.mxu1 %v806_v26 }
  0x51   : > { %751 = vmatpush.msra.mxu0 %v1049_v40  ;;  %882 = vmatpush.msra.mxu3 %v881_v62  ;;  %v874_v40 = vld [vmem:[#allocation9 + $0x140] sm:$0xff] }
  0x52   : > { %844 = vmatpush.msra.mxu2 %v793_v7  ;;  %828 = vmatpush.msra.mxu1 %v805_v29 }
  0x53   : > { %752 = vmatpush.msra.mxu0 %v1048_v41  ;;  %883 = vmatpush.msra.mxu3 %v880_v2  ;;  %v801_v41 = vld [vmem:[#allocation9 + $0x80] sm:$0xff] }
  0x54   : > { %845 = vmatpush.msra.mxu2 %v792_v12  ;;  %829 = vmatpush.msra.mxu1 %v804_v32 }
  0x55   : > { %753 = vmatpush.msra.mxu0 %v1047_v42  ;;  %884 = vmatpush.msra.mxu3 %v879_v4  ;;  %v785_v42 = vld [vmem:[#allocation9 + $0x18] sm:$0xff] }
  0x56   : > { %846 = vmatpush.msra.mxu2 %v791_v15 }
  0x57   : > { %754 = vmatpush.msra.mxu0 %v1046_v44  ;;  %885 = vmatpush.msra.mxu3 %v878_v28  ;;  %v784_v44 = vld [vmem:[#allocation9 + $0x10] sm:$0xff] }
  0x58   : > { %847 = vmatpush.msra.mxu2 %v790_v27 }
  0x59   : > { %886 = vmatpush.msra.mxu3 %v877_v31 }
  0x5a   : > { %848 = vmatpush.msra.mxu2 %v789_v30 }
  0x5b   : > { %887 = vmatpush.msra.mxu3 %v876_v34 }
  0x5c   : > { %849 = vmatpush.msra.mxu2 %v788_v33 }
  0xa1   : > { %v435_v35 = vpop.f32.mrf.mxu0 }
  0xa2   : > { %v464_v36 = vpop.f32.mrf.mxu1 }
  0xa3   : > { %v465_v37 = vadd.f32 %v464_v36, %v435_v35  ;;  %v803_v35 = vld [vmem:[#allocation9 + $0x90] sm:$0xff]  ;;  %v787_v36 = vld [vmem:[#allocation9 + $0x28] sm:$0xff] }
  0xa4   : > { %830 = vmatpush.msra.mxu1 %v803_v35  ;;  %850 = vmatpush.msra.mxu2 %v787_v36 }
  0xa6   : > { %831 = vmatpush.msra.mxu1 %v802_v38  ;;  %851 = vmatpush.msra.mxu2 %v786_v39 }
  0xa8   : > { %v504_v43 = vpop.f32.mrf.mxu2  ;;  %832 = vmatpush.msra.mxu1 %v801_v41  ;;  %852 = vmatpush.msra.mxu2 %v785_v42 }
  0xa9   : > { %v1480_v45 = vadd.f32 %v504_v43, %v465_v37  ;;  %v875_v37 = vld [vmem:[#allocation9 + $0x148] sm:$0xff]  ;;  %v873_v43 = vld [vmem:[#allocation9 + $0x138] sm:$0xff] }
  0xaa   : > { %v438_v46 = vpop.f32.mrf.mxu0  ;;  %v467_v47 = vpop.f32.mrf.mxu1  ;;  %888 = vmatpush.msra.mxu3 %v875_v37  ;;  %853 = vmatpush.msra.mxu2 %v784_v44 }
  0xab   : > { %v1482_v48 = vadd.f32 %v467_v47, %v438_v46  ;;  %v872_v46 = vld [vmem:[#allocation9 + $0x130] sm:$0xff]  ;;  %v783_v47 = vld [vmem:[#allocation9 + $0x8] sm:$0xff] }
  0xac   : > { %889 = vmatpush.msra.mxu3 %v874_v40  ;;  %854 = vmatpush.msra.mxu2 %v783_v47 }
  0xae   : > { %890 = vmatpush.msra.mxu3 %v873_v43 }
  0xaf   : > { %v558_v49 = vpop.f32.mrf.mxu3 }
  0xb0   : > { %891 = vmatpush.msra.mxu3 %v872_v46 }
  0xb1   : > { %v507_v55 = vpop.f32.mrf.mxu2 }
  0xb2   : > { %v581_v50 = vpop.f32.mrf.mxu0 }
  0xb3   : > { %v582_v51 = vadd.f32 %v581_v50, %v558_v49  ;;  %v613_v52 = vpop.f32.mrf.mxu1  ;;  %v871_v49 = vld [vmem:[#allocation9 + $0x128] sm:$0xff]  ;;  %v782_v50 = vld [vmem:[#allocation9] sm:$0xff] }
  0xb4   : > { %892 = vmatpush.msra.mxu3 %v871_v49  ;;  %855 = vmatpush.msra.mxu2 %v782_v50 }
  0xb5   : > { %v619_v57 = vadd.f32 %v613_v52, %v582_v51  ;;  %v870_v51 = vld [vmem:[#allocation9 + $0x120] sm:$0xff]  ;;  %v869_v52 = vld [vmem:[#allocation9 + $0x118] sm:$0xff] }
  0xb6   : > { %893 = vmatpush.msra.mxu3 %v870_v51 }
  0xb7   : > { %v625_v61 = vadd.f32 %v1109_v53, %v619_v57  ;;  %v561_v63 = vpop.f32.mrf.mxu3 }
  0xb8   : > { %894 = vmatpush.msra.mxu3 %v869_v52 }
  0xb9   : > { %vm627_vm2 = vcmp.ge.f32.partialorder %v625_v61, 0.0  ;;  %v629_v3 = vmul.f32 0.25, %v625_v61 }
  0xba   : > { %v584_v5 = vpop.f32.mrf.mxu0 }
  0xbb   : > { %v631_v8 = vsel %vm627_vm2, %v625_v61, %v629_v3  ;;  %v585_v9 = vadd.f32 %v584_v5, %v561_v63  ;;  %v616_v10 = vpop.f32.mrf.mxu1 }
  0xbc   : > { %633 = vst [vmem:[#allocation3 + $0x1] sm:$0xff] %v631_v8  ;;  %690 = vmatmul.f32.vlgmr.msrb.gmra.mxu2 %v631_v8 }
  0xbd   : > { %v620_v13 = vadd.f32 %v616_v10, %v585_v9 }
  0xbf   : > { %v626_v16 = vadd.f32 %v1109_v53, %v620_v13  ;;  %v868_v53 = vld [vmem:[#allocation9 + $0x110] sm:$0xff] }
  0xc0   : > { %895 = vmatpush.msra.mxu3 %v868_v53 }
  0xc1   : > { %vm628_vm3 = vcmp.ge.f32.partialorder %v626_v16, 0.0  ;;  %v630_v17 = vmul.f32 0.25, %v626_v16 }
  0xc2   : > { %896 = vmatpush.msra.mxu3 %v867_v54 }
  0xc3   : > { %v632_v18 = vsel %vm628_vm3, %v626_v16, %v630_v17  ;;  %v637_v19 = vld [vmem:[#allocation3] sm:$0xff]  ;;  %v516_v16 = vadd.f32 %v1108_v14, %v1480_v45 }
  0xc4   : > { %634 = vst [vmem:[#allocation3 + $0x9] sm:$0xff] %v632_v18  ;;  %713 = vmatmul.f32.vlgmr.msrb.gmra.mxu3 %v637_v19  ;;  %693 = vmatmul.f32.gmra.mxu2 %v632_v18  ;;  %v1111_v19 = vld [vmem:[%s1514_s8] ss:$0 sm:$0xff] }
  0xc5   : > { %897 = vmatpush.msra.mxu3 %v866_v56  ;;  %vm518_vm6 = vcmp.ge.f32.partialorder %v516_v16, 0.0 }
  0xcb   : > { %v638_v20 = vld [vmem:[#allocation3 + $0x8] sm:$0xff] }
  0xcc   : > { %v720_v21 = vld [vmem:[#allocation3 + $0x2] sm:$0xff]  ;;  %716 = vmatmul.f32.gmra.mxu3 %v638_v20  ;;  %v721_v22 = vld [vmem:[#allocation3 + $0xa] sm:$0xff]  ;;  %v520_v20 = vmul.f32 0.25, %v516_v16 }
  0xcd   : > { %755 = vmatmul.f32.vlgmr.msra.gmra.mxu0 %v720_v21  ;;  %v511_v21 = vadd.f32 %v507_v55, %v1482_v48 }
  0xce   : > { %v522_v45 = vsel %vm518_vm6, %v516_v16, %v520_v20 }
  0xcf   : > { %v517_v25 = vadd.f32 %v1108_v14, %v511_v21 }
  0xd1   : > { %v521_v30 = vmul.f32 0.25, %v517_v25  ;;  %vm519_vm7 = vcmp.ge.f32.partialorder %v517_v25, 0.0 }
  0xd3   : > { %v523_v33 = vsel %vm519_vm7, %v517_v25, %v521_v30 }
  0xd5   : > { %758 = vmatmul.f32.gmra.mxu0 %v721_v22 }
 0x13f   : > { %v691_v57 = vpop.f32.mrf.mxu2 }
 0x147   : > { %v714_v58 = vpop.f32.mrf.mxu3  ;;  %v694_v1 = vpop.f32.mrf.mxu2 }
 0x148   : > { %v715_v59 = vadd.f32 %v714_v58, %v691_v57 }
 0x14a   : > { %v756_v61 = vpop.f32.mrf.mxu0 }
 0x14b   : > { %v762_v62 = vadd.f32 %v756_v61, %v715_v59 }
 0x14d   : > { %v768_v63 = vadd.f32 %v1110_v60, %v762_v62 }
 0x14f   : > { %vm770_vm4 = vcmp.ge.f32.partialorder %v768_v63, 0.0  ;;  %v772_v0 = vmul.f32 0.25, %v768_v63  ;;  %v717_v2 = vpop.f32.mrf.mxu3 }
 0x150   : > { %v718_v4 = vadd.f32 %v717_v2, %v694_v1 }
 0x151   : > { %v774_v3 = vsel %vm770_vm4, %v768_v63, %v772_v0 }
 0x152   : > { %776 = vst [vmem:[#allocation4 + $0x1] sm:$0xff] %v774_v3  ;;  %v759_v5 = vpop.f32.mrf.mxu0  ;;  %833 = vmatmul.f32.vlgmr.msra.gmra.mxu1 %v774_v3 }
 0x153   : > { %v763_v6 = vadd.f32 %v759_v5, %v718_v4 }
 0x155   : > { %v769_v7 = vadd.f32 %v1110_v60, %v763_v6 }
 0x157   : > { %vm771_vm5 = vcmp.ge.f32.partialorder %v769_v7, 0.0  ;;  %v773_v8 = vmul.f32 0.25, %v769_v7 }
 0x159   : > { %v775_v9 = vsel %vm771_vm5, %v769_v7, %v773_v8  ;;  %v780_v10 = vld [vmem:[#allocation4] sm:$0xff] }
 0x15a   : > { %777 = vst [vmem:[#allocation4 + $0x9] sm:$0xff] %v775_v9  ;;  %856 = vmatmul.f32.vlgmr.msra.gmra.mxu2 %v780_v10  ;;  %836 = vmatmul.f32.gmra.mxu1 %v775_v9 }
 0x161   : > { %v781_v11 = vld [vmem:[#allocation4 + $0x8] sm:$0xff] }
 0x162   : > { %v863_v12 = vld [vmem:[#allocation4 + $0x2] sm:$0xff]  ;;  %859 = vmatmul.f32.gmra.mxu2 %v781_v11  ;;  %v864_v13 = vld [vmem:[#allocation4 + $0xa] sm:$0xff] }
 0x163   : > { %898 = vmatmul.f32.vlgmr.msra.gmra.mxu3 %v863_v12 }
 0x16b   : > { %901 = vmatmul.f32.gmra.mxu3 %v864_v13 }
 0x1cf   : > { %v834_v17 = vpop.f32.mrf.mxu1 }
 0x1d7   : > { %v837_v28 = vpop.f32.mrf.mxu1 }
 0x1dd   : > { %v857_v15 = vpop.f32.mrf.mxu2 }
 0x1de   : > { %v858_v18 = vadd.f32 %v857_v15, %v834_v17 }
 0x1e5   : > { %v860_v26 = vpop.f32.mrf.mxu2 }
 0x1e6   : > { %v899_v22 = vpop.f32.mrf.mxu3  ;;  %v861_v29 = vadd.f32 %v860_v26, %v837_v28 }
 0x1e7   : > { %v905_v23 = vadd.f32 %v899_v22, %v858_v18 }
 0x1e9   : > { %v911_v24 = vadd.f32 %v1111_v19, %v905_v23 }
 0x1eb   : > { %v913_v27 = vadd.f32 %v911_v24, %v522_v45 }
 0x1ed   : > { %915 = vst [vmem:[%s382_s12] sm:$0xff] %v913_v27 }
 0x1ee   : > { %v902_v31 = vpop.f32.mrf.mxu3 }
 0x1ef   : > { %v906_v48 = vadd.f32 %v902_v31, %v861_v29 }
 0x1f1   : > { %v912_v32 = vadd.f32 %v1111_v19, %v906_v48 }
 0x1f3   : > { %v914_v34 = vadd.f32 %v912_v32, %v523_v33 }
 0x1f5   : > { %916 = vst [vmem:[%s382_s12 + $0x8] sm:$0xff] %v914_v34 }
 0x1f6 PF: > { %s21_s30 = sadd.s32 1, %s1216_s30  }
 0x1f7   : > { %p18_p7 = scmp.ge.s32.totalorder %s21_s30, 4  }
 0x1f9   :  { %20 = sbr.rel (!%p18_p7) target bundleno = 2 (0x2), region = 107 }
 0x1fe   :  { %938 = vsyncpa [#allocation6], 1 }
 0x1ff   :  { %940 = vsyncpa [#allocation6 + $0x1], 1 }
 0x200   :  { %941 = vsyncpa [#allocation8], 1 }

</bundles_post_ra>
